<compile_context>
chip_gen: v6e
topology: v6e:2x2x1
jax: 0.10.0
libtpu: 0.0.40
codegen_flags: <defaults>
</compile_context>

<pallas_src>
import jax
import jax.numpy as jnp
from jax import lax
from jax.experimental import pallas as pl
from jax.experimental.pallas import tpu as pltpu


def _round_up(n: int, m: int) -> int:
    return ((n + m - 1) // m) * m


def _proto_dist_kernel(x_ref, pt_ref, psq_ref, d_ref):
    # x_ref:   (TM, D)   streamed tile of flattened inputs
    # pt_ref:  (D, TP)   prototypes, transposed, scaled by -2 (resident / P-tiled)
    # psq_ref: (1, TP)   precomputed ||p||^2 row
    # d_ref:   (TM, TP)  output distances tile
    x = x_ref[...]
    x_sq = jnp.sum(x * x, axis=-1, keepdims=True)             # (TM, 1)
    # MXU: (TM, D) @ (D, TP) — no in-kernel transpose of the prototype tile.
    cross = lax.dot_general(
        x, pt_ref[...],
        dimension_numbers=(((1,), (0,)), ((), ())),
        preferred_element_type=jnp.float32,
    )                                                          # == -2 * x.p
    # ||x||^2 + ||p||^2 - 2 x.p, clamped at 0 against cancellation error
    # (intentional tiny deviation from the exact expansion; true sq-distances
    #  are non-negative and this stays inside 1e-4 tolerance).
    d_ref[...] = jnp.maximum(x_sq + psq_ref[...] + cross, 0.0)


def _choose_row_tile(m: int, target: int):
    """Largest divisor of m that is <= target, preferring 256/128/8 alignment."""
    cap = min(m, target)
    for align in (256, 128, 8):
        t = (cap // align) * align
        while t >= align:
            if m % t == 0:
                return t
            t -= align
    return None


def _choose_col_tile(p_pad: int, d: int, budget_bytes: int) -> int:
    """Largest multiple-of-128 divisor of p_pad whose double-buffered (D, tp)
    prototype block (+ psq row) fits within budget_bytes."""
    best = 128
    t = 128
    while t <= p_pad:
        if p_pad % t == 0 and 8 * (d * t + t) <= budget_bytes:
            best = t
        t += 128
    return best


def prototype_layer_forward(x: jax.Array, prototypes: jax.Array, *, tm_target: int = 512):
    """Forward pass of PrototypeLayer.

    Args:
      x:          (batch, seq, vect_size)
      prototypes: (n_protos, vect_size)
    Returns:
      (distances (batch, seq, n_protos), prototypes)
    """
    B, S, D = x.shape
    P, D2 = prototypes.shape
    assert D == D2, "vect_size mismatch between x and prototypes"

    M = B * S
    x_flat = x.reshape(M, D).astype(jnp.float32)
    protos_f32 = prototypes.astype(jnp.float32)

    # Lane-dense padded prototype count (output last dim maps to lanes).
    P_pad = _round_up(P, 128)
    pad_p = P_pad - P
    # One-time wrapper work: transpose to (D, P), fold in the -2, pad with zero
    # prototypes (zero rows give d = ||x||^2 >= 0 and are sliced off below).
    pt = jnp.pad((-2.0) * protos_f32.T, ((0, 0), (0, pad_p)))
    psq = jnp.pad(jnp.sum(protos_f32 * protos_f32, axis=-1, keepdims=True).T,
                  ((0, 0), (0, pad_p)))

    # VMEM budget (per TensorCore): query the chip, keep ~30% headroom.
    try:
        vmem_cap = int(pltpu.get_tpu_info().vmem_capacity_bytes)
    except Exception:
        vmem_cap = 64 * 1024 * 1024  # conservative default: v7x per-TC physical
    usable = int(vmem_cap * 0.7)

    # Prototype tile: keep the whole (D, P_pad) block resident unless its
    # double-buffered footprint would eat more than ~1/3 of the budget.
    tp = _choose_col_tile(P_pad, D, usable // 3)

    # Row tile: biggest well-aligned divisor of M that, together with the
    # prototype tiles and the output tile (all double-buffered), fits VMEM.
    fixed = 8 * (D * tp + tp)              # protos^T + psq blocks, x2 buffers
    per_row = 8 * (D + tp)                 # x row + out row, x2 buffers
    desired = max(8, min(tm_target, (usable - fixed) // per_row))
    desired = (desired // 8) * 8

    tm = _choose_row_tile(M, desired)
    if tm is not None and tm >= min(desired, 128):
        m_pad, pad_rows = M, 0
    else:
        # No decent divisor of M: pad the row axis once (extra HBM copy of x,
        # but large aligned tiles matter more at the HBM roofline).
        # TODO(synk): a masked last tile would avoid this copy entirely.
        tm = min(desired, _round_up(M, 8))
        m_pad = _round_up(M, tm)
        pad_rows = m_pad - M
        if pad_rows:
            x_flat = jnp.pad(x_flat, ((0, pad_rows), (0, 0)))

    grid = (m_pad // tm, P_pad // tp)

    # Double-buffered footprint of ALL BlockSpec operands.
    est_bytes = 2 * 4 * (tm * D + D * tp + tp + tm * tp)
    if est_bytes > 12 * 1024 * 1024:
        compiler_params = pltpu.CompilerParams(
            dimension_semantics=("parallel", "parallel"),
            vmem_limit_bytes=min(int(est_bytes * 1.5), usable),
        )
    else:
        compiler_params = pltpu.CompilerParams(
            dimension_semantics=("parallel", "parallel"),
        )

    distances_flat = pl.pallas_call(
        _proto_dist_kernel,
        out_shape=jax.ShapeDtypeStruct((m_pad, P_pad), jnp.float32),
        grid=grid,
        in_specs=[
            pl.BlockSpec((tm, D), lambda i, j: (i, 0)),   # x tile, streamed over M
            pl.BlockSpec((D, tp), lambda i, j: (0, j)),   # -2 * protos^T, P-tiled
            pl.BlockSpec((1, tp), lambda i, j: (0, j)),   # ||p||^2 row, P-tiled
        ],
        out_specs=pl.BlockSpec((tm, tp), lambda i, j: (i, j)),
        compiler_params=compiler_params,
    )(x_flat, pt, psq)

    distances = distances_flat[:M, :P].reshape(B, S, P)
    return distances, prototypes


if __name__ == "__main__":
    key = jax.random.PRNGKey(0)
    k_x, k_p = jax.random.split(key)

    batch, seq, vect_size, n_protos = 2, 8, 32, 16

    x = jax.random.normal(k_x, (batch, seq, vect_size), dtype=jnp.float32)
    # deterministic "randn" init of the prototypes parameter
    prototypes = jax.random.normal(k_p, (n_protos, vect_size), dtype=jnp.float32)

    distances, protos_out = prototype_layer_forward(x, prototypes)
    jax.block_until_ready(distances)
    jax.block_until_ready(protos_out)

    # sanity check against pure-JAX reference (same semantics as the torch module)
    ref = jnp.sum((x[:, :, None, :] - prototypes[None, None, :, :]) ** 2, axis=-1)
    assert distances.shape == (batch, seq, n_protos)
    assert protos_out.shape == (n_protos, vect_size)
    assert jnp.allclose(distances, ref, atol=1e-4, rtol=1e-4)
    assert bool(jnp.all(distances >= 0.0))

    print("KERNEL_OK")
</pallas_src>

<mosaic_0001>
module attributes {stable_mosaic.version = 11 : i64} {
  func.func @_proto_dist_kernel(%arg0: i32, %arg1: i32, %arg2: memref<16x32xf32, #tpu.memory_space<vmem>>, %arg3: memref<32x128xf32, #tpu.memory_space<vmem>>, %arg4: memref<1x128xf32, #tpu.memory_space<vmem>>, %arg5: memref<16x128xf32, #tpu.memory_space<vmem>>) attributes {dimension_semantics = [#tpu.dimension_semantics<parallel>, #tpu.dimension_semantics<parallel>], iteration_bounds = array<i64: 1, 1>, scalar_prefetch = 0 : i64, scratch_operands = 0 : i64, tpu.core_type = #tpu.core_type<tc>, window_params = [{transform_indices = @transform_0, window_bounds = array<i64: 16, 32>}, {transform_indices = @transform_1, window_bounds = array<i64: 32, 128>}, {transform_indices = @transform_2, window_bounds = array<i64: 1, 128>}, {transform_indices = @transform_3, window_bounds = array<i64: 16, 128>}]} {
    %c0 = arith.constant 0 : index
    %c0_0 = arith.constant 0 : index
    %0 = vector.load %arg2[%c0, %c0_0] : memref<16x32xf32, #tpu.memory_space<vmem>>, vector<16x32xf32>
    %1 = arith.mulf %0, %0 : vector<16x32xf32>
    %cst = arith.constant dense<0.000000e+00> : vector<16xf32>
    %2 = vector.multi_reduction <add>, %1, %cst [1] : vector<16x32xf32> to vector<16xf32>
    %3 = vector.shape_cast %2 : vector<16xf32> to vector<16x1xf32>
    %c0_1 = arith.constant 0 : index
    %c0_2 = arith.constant 0 : index
    %4 = vector.load %arg3[%c0_1, %c0_2] : memref<32x128xf32, #tpu.memory_space<vmem>>, vector<32x128xf32>
    %cst_3 = arith.constant dense<0.000000e+00> : vector<16x128xf32>
    %5 = tpu.matmul %0, %4, %cst_3 {dimension_numbers = #tpu.dot_dimension_numbers<[1], [0], [0], [1], [0, 0, 1, 1], [], []>} : vector<16x32xf32>, vector<32x128xf32>, vector<16x128xf32> -> vector<16x128xf32>
    %c0_4 = arith.constant 0 : index
    %c0_5 = arith.constant 0 : index
    %6 = vector.load %arg4[%c0_4, %c0_5] : memref<1x128xf32, #tpu.memory_space<vmem>>, vector<1x128xf32>
    %7 = vector.broadcast %3 : vector<16x1xf32> to vector<16x128xf32>
    %8 = vector.broadcast %6 : vector<1x128xf32> to vector<16x128xf32>
    %9 = arith.addf %7, %8 : vector<16x128xf32>
    %10 = arith.addf %9, %5 : vector<16x128xf32>
    %cst_6 = arith.constant 0.000000e+00 : f32
    %11 = vector.broadcast %cst_6 : f32 to vector<16x128xf32>
    %12 = arith.maximumf %10, %11 : vector<16x128xf32>
    %c0_7 = arith.constant 0 : index
    %c0_8 = arith.constant 0 : index
    %13 = vector.load %arg5[%c0_7, %c0_8] : memref<16x128xf32, #tpu.memory_space<vmem>>, vector<16x128xf32>
    tpu.vector_store %arg5[%c0_7, %c0_8], %12 {strides = array<i32>} : memref<16x128xf32, #tpu.memory_space<vmem>>, vector<16x128xf32>,
    return
  }
  func.func @transform_0(%arg0: i32, %arg1: i32) -> (i32, i32) {
    %c0_i32 = arith.constant 0 : i32
    %c0_i32_0 = arith.constant 0 : i32
    return %arg0, %c0_i32 : i32, i32
  }
  func.func @transform_1(%arg0: i32, %arg1: i32) -> (i32, i32) {
    %c0_i32 = arith.constant 0 : i32
    %c0_i32_0 = arith.constant 0 : i32
    return %c0_i32, %arg1 : i32, i32
  }
  func.func @transform_2(%arg0: i32, %arg1: i32) -> (i32, i32) {
    %c0_i32 = arith.constant 0 : i32
    %c0_i32_0 = arith.constant 0 : i32
    return %c0_i32, %arg1 : i32, i32
  }
  func.func @transform_3(%arg0: i32, %arg1: i32) -> (i32, i32) {
    %c0_i32 = arith.constant 0 : i32
    return %arg0, %arg1 : i32, i32
  }
}

</mosaic_0001>

<bundles_post_ra>
// kernel: tpu_custom_call.1
= control target key start
LH: loop header
LB: loop body
LE: loop exit
PB: predicated region body
PF: predicated region fallthrough
CT: control target
= control target key end

     0   :  { %8 = vsyncpa [#allocation3], 0  ;;  %s313_s0 = inlined_call_operand.hbm [shape: f32[16,32], index: 0, kind: input, shape index: {}]   ;;  %s314_s1 = inlined_call_operand.hbm [shape: f32[32,128], index: 1, kind: input, shape index: {}]   ;;  %s315_s2 = inlined_call_operand.vmem [shape: f32[1,128], index: 2, kind: input, shape index: {}]   ;;  %s316_s3 = inlined_call_operand.hbm [shape: f32[16,128], index: 3, kind: output, shape index: {}]  }
   0x1   :  { %9 = vsyncpa [#allocation6], 0 }
   0x2   :  { %10 = vsyncpa [#allocation4], 0  ;;  %s263_s12 = smov [#allocation2]  }
   0x3   :  { %s16_s13 = sshll.u32 %s263_s12, 4  ;;  %s17_s13 = int_to_ptr.vmem [resolvable:$true] %s16_s13 }
   0x4   :  { %s205_s14 = scalar_lea.vmem %s17_s13, 256  ;;  %p210_p1 = scmp.lt.s32.totalorder %s17_s13, %s17_s13 }
   0x5   :  { %p206_p0 = scmp.ne.s32.totalorder %s17_s13, %s205_s14  ;;  %p211_p2 = scmp.lt.s32.totalorder %s205_s14, %s205_s14 }
   0x7   :  { %p212_p3 = por %p211_p2, %p210_p1 }
   0x9   :  { %p213_p4 = pnand %p212_p3, %p206_p0 }
   0xb   :  { %216 = shalt.err (!%p213_p4)
}
   0xc   :  { %s264_s15 = smov 128   ;;  %s265_s16 = smov 8  }
   0xd   :  { %22 = dma.hbm_to_vmem [thread:$0]  %s313_s0, 256, %s17_s13, [#allocation3], %s264_s15, %s264_s15, %s265_s16  }
   0xe   :  { %s266_s19 = smov [#allocation5]  }
   0xf   :  { %s28_s20 = sshll.u32 %s266_s19, 4  ;;  %s29_s20 = int_to_ptr.vmem [resolvable:$true] %s28_s20 }
  0x10   :  { %s225_s21 = scalar_lea.vmem %s29_s20, 512  ;;  %p230_p6 = scmp.lt.s32.totalorder %s29_s20, %s29_s20 }
  0x11   :  { %p226_p5 = scmp.ne.s32.totalorder %s29_s20, %s225_s21  ;;  %p231_p7 = scmp.lt.s32.totalorder %s225_s21, %s225_s21 }
  0x13   :  { %p232_p8 = por %p231_p7, %p230_p6 }
  0x15   :  { %p233_p9 = pnand %p232_p8, %p226_p5 }
  0x17   :  { %236 = shalt.err (!%p233_p9)
}
  0x18   :  { %34 = dma.hbm_to_vmem [thread:$0]  %s314_s1, 512, %s29_s20, [#allocation6], %s264_s15, %s264_s15, %s265_s16  }
  0x19   :  { %257 = dma.done.wait [#allocation3], 256  }
  0x1a   :  { %258 = vsyncadd [#allocation3], 4294967040 }
  0x1b   :  { %259 = dma.done.wait [#allocation6], 512  }
  0x1c   :  { %260 = vsyncadd [#allocation6], 4294966784  ;;  %vm47_vm0 = vcmask 261120   ;;  %v57_v0 = vld [vmem:[#allocation5 + $0x18] sm:$0xff]  ;;  %v56_v1 = vld [vmem:[#allocation5 + $0x10] sm:$0xff]  ;;  %s267_s24 = smov [#allocation7]  }
  0x1d   :  { %181 = vmatprep.subr.mxu0 %v57_v0  ;;  %v43_v2 = vld [vmem:[#allocation2] sm:$0xff]  ;;  %v44_v3 = vld [vmem:[#allocation2 + $0x8] sm:$0xff]  ;;  %v55_v4 = vld [vmem:[#allocation5 + $0x8] sm:$0xff]  ;;  %s159_s25 = sshll.u32 %s267_s24, 4  ;;  %s160_s25 = int_to_ptr.vmem [resolvable:$true] %s159_s25 }
  0x1e   :  { %182 = vmatpush3.msra.mxu0 %v57_v0  ;;  %v45_v5 = vmul.f32 %v43_v2, %v43_v2  ;;  %189 = vmatprep.mubr.msk.f32.mxu0 %vm47_vm0, %v43_v2  ;;  %v46_v6 = vmul.f32 %v44_v3, %v44_v3  ;;  %v54_v7 = vld [vmem:[#allocation5] sm:$0xff]  ;;  %v174_v12 = vld [vmem:[%s315_s2] ss:$0 sm:$0xff]  ;;  %s237_s26 = scalar_lea.vmem %s160_s25, 256  ;;  %p242_p11 = scmp.lt.s32.totalorder %s160_s25, %s160_s25 }
  0x1f   :  { %183 = vmatprep.subr.mxu0 %v56_v1  ;;  %p238_p10 = scmp.ne.s32.totalorder %s160_s25, %s237_s26  ;;  %p243_p12 = scmp.lt.s32.totalorder %s237_s26, %s237_s26 }
  0x20   :  { %184 = vmatpush3.msra.mxu0 %v56_v1  ;;  %v48_v8 = vsel %vm47_vm0, %v45_v5, 0.0  ;;  %v51_v9 = vsel %vm47_vm0, %v46_v6, 0.0 }
  0x21   :  { %185 = vmatprep.subr.mxu0 %v55_v4  ;;  %49 = vadd.xlane.f32.xlu0 %v48_v8  ;;  %p244_p13 = por %p243_p12, %p242_p11 }
  0x22   :  { %186 = vmatpush3.msra.mxu0 %v55_v4 }
  0x23   :  { %187 = vmatprep.subr.mxu0 %v54_v7  ;;  %p245_p0 = pnand %p244_p13, %p238_p10 }
  0x24   :  { %188 = vmatpush3.msra.mxu0 %v54_v7 }
  0x25   :  { %190 = vmatmul.mubr.msk.f32.vlgmr.msra.gmra.mxu0 %vm47_vm0, %v44_v3  ;;  %52 = vadd.xlane.f32.xlu0 %v51_v9 }
  0xaa   :  { %v50_v10 = vpop.xlane.xlu0 %49 }
  0xab   :  { %v146_v15 = vadd.f32 %v174_v12, %v50_v10 }
  0xae   :  { %v53_v11 = vpop.xlane.xlu0 %52 }
  0xaf   :  { %v147_v13 = vadd.f32 %v174_v12, %v53_v11 }
  0xe5   :  { %v191_v14 = vpop.f32.mrf.mxu0 }
  0xe6   :  { %v149_v16 = vadd.f32 %v191_v14, %v147_v13 }
  0xe7   :  { %v130_v17 = vpop.f32.mrf.mxu0 }
  0xe8   :  { %v151_v18 = vmax.f32 %v149_v16, 0.0  ;;  %v148_v19 = vadd.f32 %v146_v15, %v130_v17 }
  0xea   :  { %153 = vst [vmem:[#allocation7 + $0x8] sm:$0xff] %v151_v18  ;;  %v150_v20 = vmax.f32 %v148_v19, 0.0 }
  0xec   :  { %152 = vst [vmem:[#allocation7] sm:$0xff] %v150_v20 }
  0xed   :  { %248 = shalt.err (!%p245_p0)
}
  0xee   :  { %165 = dma.vmem_to_hbm [thread:$0]  %s160_s25, 256, %s316_s3, [#allocation4], %s264_s15, %s264_s15, %s265_s16  }
  0xef   :  { %261 = dma.done.wait [#allocation4], 256  }
  0xf0   :  { %262 = vsyncadd [#allocation4], 4294967040 }
  0xf1   :  { %169 = vsyncpa [#allocation3], 1 }
  0xf2   :  { %170 = vsyncpa [#allocation6], 1 }
  0xf3   :  { %171 = vsyncpa [#allocation4], 1 }

</bundles_post_ra>
